<compile_context>
chip_gen: v7x
topology: tpu7x:2x2x1
jax: 0.10.0
libtpu: 0.0.40
codegen_flags: <defaults>
</compile_context>

<pallas_src>
import functools

import jax
import jax.numpy as jnp
from jax import lax
from jax.experimental import pallas as pl
from jax.experimental.pallas import tpu as pltpu

# ---------------------------------------------------------------------------
# Constants mirroring Combine_Model_and_Loss.__init__
# ---------------------------------------------------------------------------
POS_WEIGHT = 10.0        # BCEWithLogitsLoss(pos_weight=torch.tensor([10.0]))
IOU_SMOOTH = 1.0         # IoULoss smooth term
VAR_WEIGHT = 1.0         # NDPushPullLoss(1.0, 1.0, 1.0, 5.0, 200)
DIST_WEIGHT = 1.0
MARGIN_VAR = 1.0
MARGIN_DIST = 5.0
IGNORE_LABEL = 200       # anything outside 1..K_MAX (incl. 200) is ignored by the one-hot
K_MAX = 4                # instance ids are 1..K_MAX (0 = background)

LANES = 128
MAX_ROW_TILE = 2048      # rows per loss-kernel grid step (2048x128 f32 = 1 MiB / stream)
MAX_CONV_TILE = 8192     # pixel columns per conv-head grid step
VMEM_LIMIT_BYTES = 48 * 1024 * 1024   # < v7x 64 MiB physical; ample on v5e/v6e

# fused head-tensor channel layout (chosen so 4-channel embedding blocks are aligned)
N_HEADS = 12
EMB_CH = 4
CH_EMB_BEV = 0           # channels 0:4  = BEV embedding
CH_EMB_2D = 4            # channels 4:8  = 2D embedding
CH_PRED = 8              # BEV seg logits
CH_OFFSET = 9            # BEV offset-y logits
CH_Z = 10                # BEV z regression
CH_PRED2D = 11           # 2D seg logits
CHB_EMB_BEV = 0          # channel-block index (block size 4) -> channels 0:4
CHB_EMB_2D = 1           # channel-block index (block size 4) -> channels 4:8


def _cdiv(a, b):
    return (a + b - 1) // b


def _round_up(a, b):
    return _cdiv(a, b) * b


def _mosaic(dims):
    return pltpu.CompilerParams(dimension_semantics=dims,
                                vmem_limit_bytes=VMEM_LIMIT_BYTES)


def _pick_conv_tile(hwp, max_tile=MAX_CONV_TILE):
    """Largest multiple-of-128 divisor of hwp that fits the per-step tile budget."""
    best = LANES
    t = LANES
    while t <= min(max_tile, hwp):
        if hwp % t == 0:
            best = t
        t += LANES
    return best


def _row_tiling(r, max_rows=MAX_ROW_TILE):
    """(row_tile, n_chunks) with row_tile * n_chunks == r; no row padding, ever."""
    if r <= max_rows:
        return r, 1
    best = None
    t = 8
    while t <= max_rows:
        if r % t == 0:
            best = t
        t += 8
    if best is None:          # no clean multiple-of-8 divisor: one (big) chunk
        return r, 1
    return best, r // best


def _as_rows(x, dtype=jnp.float32):
    """(B, C, H, W) -> ((B, C, R, 128) view, HW, HWp).  A copy happens only when
    H*W is not a multiple of 128 (the reshape itself is free / contiguous)."""
    b, c, h, w = x.shape
    hw = h * w
    hwp = _round_up(hw, LANES)
    flat = x.reshape(b, c, hw).astype(dtype)
    if hwp != hw:
        flat = jnp.pad(flat, ((0, 0), (0, 0), (0, hwp - hw)))
    return flat.reshape(b, c, hwp // LANES, LANES), hw, hwp


# index maps: grid -> (batch, channel, row-chunk, 0)
def _ch_map(b, i, *, ch):
    return (b, ch, i, 0)


def _chblk_map(b, *, ch):
    return (b, ch, 0, 0)


# ---------------------------------------------------------------------------
# In-kernel math helpers
# ---------------------------------------------------------------------------
def _tail_mask(shape, chunk, row_tile, n_valid):
    """1.0 where the flattened per-batch pixel index < n_valid (tail padding -> 0)."""
    sub = lax.broadcasted_iota(jnp.int32, shape, 0)
    lane = lax.broadcasted_iota(jnp.int32, shape, 1)
    idx = (chunk * row_tile + sub) * LANES + lane
    return (idx < n_valid).astype(jnp.float32)


def _seg_terms(x, y):
    """pos-weighted BCE-with-logits, sigmoid*y and sigmoid+y — one exp + one log."""
    e = jnp.exp(-jnp.abs(x))
    # log1p(e) would be marginally more accurate; log(1+e) kept for Mosaic-lowering safety
    sp_neg = jnp.maximum(-x, 0.0) + jnp.log(1.0 + e)          # softplus(-x)
    bce = POS_WEIGHT * y * sp_neg + (1.0 - y) * (x + sp_neg)
    s = jnp.where(x >= 0.0, 1.0, e) / (1.0 + e)               # stable sigmoid, exact recip
    return bce, s * y, s + y


# ---------------------------------------------------------------------------
# Kernel 1: fused BEV losses — seg BCE + IoU parts, offset BCE (logits space),
#           z MSE.  One streaming pass over pred/offset/z + 3 GT maps.
# ---------------------------------------------------------------------------
def _bev_loss_kernel(pred_ref, off_ref, z_ref, seg_ref, gtoff_ref, gtz_ref, out_ref,
                     a_bce, a_int, a_tot, a_obce, a_mse,
                     *, n_valid, padded, row_tile):
    i = pl.program_id(1)

    @pl.when(i == 0)
    def _():
        a_bce[...] = jnp.zeros_like(a_bce)
        a_int[...] = jnp.zeros_like(a_int)
        a_tot[...] = jnp.zeros_like(a_tot)
        a_obce[...] = jnp.zeros_like(a_obce)
        a_mse[...] = jnp.zeros_like(a_mse)

    x = pred_ref[0, 0]
    y = seg_ref[0, 0]
    o = off_ref[0, 0]
    zz = z_ref[0, 0]
    t = gtoff_ref[0, 0]
    tz = gtz_ref[0, 0]

    bce, inter, tot = _seg_terms(x, y)

    # torch.nn.BCELoss(gt_seg * sigmoid(offset_y), gt_offset_y) rewritten in
    # logits space (gt_seg is binary), with torch's -100 log clamp:
    #   y=1: t*min(softplus(-o),100) + (1-t)*min(o+softplus(-o),100);  y=0: 100*t
    eo = jnp.exp(-jnp.abs(o))
    spn_o = jnp.maximum(-o, 0.0) + jnp.log(1.0 + eo)          # -log(sigmoid(o))
    pos_t = jnp.minimum(spn_o, 100.0)
    neg_t = jnp.minimum(o + spn_o, 100.0)                     # -log(1 - sigmoid(o))
    obce = jnp.where(y > 0.5, t * pos_t + (1.0 - t) * neg_t, 100.0 * t)

    d = y * zz - tz
    mse = d * d

    if padded:   # compile-time gate: only when H*W is not a multiple of 128
        m = _tail_mask(x.shape, i, row_tile, n_valid)
        bce = bce * m
        inter = inter * m
        tot = tot * m
        obce = obce * m
        mse = mse * m

    a_bce[...] += bce
    a_int[...] += inter
    a_tot[...] += tot
    a_obce[...] += obce
    a_mse[...] += mse

    @pl.when(i == pl.num_programs(1) - 1)
    def _():
        lane = lax.broadcasted_iota(jnp.int32, (8, LANES), 1)
        out_ref[0] = (jnp.where(lane == 0, jnp.sum(a_bce[...]), 0.0)
                      + jnp.where(lane == 1, jnp.sum(a_int[...]), 0.0)
                      + jnp.where(lane == 2, jnp.sum(a_tot[...]), 0.0)
                      + jnp.where(lane == 3, jnp.sum(a_obce[...]), 0.0)
                      + jnp.where(lane == 4, jnp.sum(a_mse[...]), 0.0))


# ---------------------------------------------------------------------------
# Kernel 2: N fused seg-loss pairs (BCEWithLogits(pos_weight) + soft-IoU sums)
#           — used to fuse the pred_2d and warped-pred_2d losses in one launch.
# ---------------------------------------------------------------------------
def _seg_multi_kernel(*args, n_pairs, n_valid, padded, row_tile):
    in_refs = args[:2 * n_pairs]
    out_ref = args[2 * n_pairs]
    accs = args[2 * n_pairs + 1:]
    i = pl.program_id(1)

    @pl.when(i == 0)
    def _():
        for a in accs:
            a[...] = jnp.zeros_like(a)

    m = None
    if padded:
        m = _tail_mask((row_tile, LANES), i, row_tile, n_valid)

    for p in range(n_pairs):
        x = in_refs[2 * p][0, 0]
        y = in_refs[2 * p + 1][0, 0]
        bce, inter, tot = _seg_terms(x, y)
        if m is not None:
            bce = bce * m
            inter = inter * m
            tot = tot * m
        accs[3 * p][...] += bce
        accs[3 * p + 1][...] += inter
        accs[3 * p + 2][...] += tot

    @pl.when(i == pl.num_programs(1) - 1)
    def _():
        lane = lax.broadcasted_iota(jnp.int32, (8, LANES), 1)
        res = jnp.zeros((8, LANES), jnp.float32)
        for idx in range(3 * n_pairs):
            res = res + jnp.where(lane == idx, jnp.sum(accs[idx][...]), 0.0)
        out_ref[0] = res


# ---------------------------------------------------------------------------
# Kernel 3: fused push-pull (discriminative embedding).  Counts, centers and
#           the pull hinge are all computed from ONE resident (C, R, 128) block
#           (emb/ids read from HBM exactly once, no MXU/XLU-transpose einsum).
# ---------------------------------------------------------------------------
def _sum_all2(x):
    """(rows, lanes) -> (1, 1) full reduction (lane reduce then sublane reduce)."""
    return jnp.sum(jnp.sum(x, axis=-1, keepdims=True), axis=0, keepdims=True)


def _pushpull_packed(emb, key, n_ch):
    """emb (C, R, 128) f32, key (R, 128) int32 -> packed (8, 128) summary:
       row 0 lane k = count_k, row 1 lane k = pull_sum_k, row 2+c lane k = center_{k,c}."""
    masks = [(key == (k + 1)).astype(jnp.float32) for k in range(K_MAX)]
    counts = [_sum_all2(masks[k]) for k in range(K_MAX)]              # (1,1) each

    centers = []
    for k in range(K_MAX):
        inv = 1.0 / jnp.maximum(counts[k], 1.0)
        centers.append([_sum_all2(masks[k] * emb[c]) * inv for c in range(n_ch)])

    # pull: distance of every labelled pixel to its own instance centre
    d2_sel = jnp.zeros(key.shape, jnp.float32)
    for k in range(K_MAX):
        d2_k = jnp.zeros(key.shape, jnp.float32)
        for c in range(n_ch):
            diff = emb[c] - centers[k][c]
            d2_k = d2_k + diff * diff
        d2_sel = d2_sel + masks[k] * d2_k
    dist = jnp.sqrt(d2_sel + 1e-12)          # eps keeps the gradient finite at the centre
    h = jnp.maximum(dist - MARGIN_VAR, 0.0)
    hh = h * h
    pulls = [_sum_all2(masks[k] * hh) for k in range(K_MAX)]

    si = lax.broadcasted_iota(jnp.int32, (8, LANES), 0)
    li = lax.broadcasted_iota(jnp.int32, (8, LANES), 1)
    res = jnp.zeros((8, LANES), jnp.float32)
    for k in range(K_MAX):
        res = res + jnp.where((si == 0) & (li == k), counts[k], 0.0)
        res = res + jnp.where((si == 1) & (li == k), pulls[k], 0.0)
        for c in range(n_ch):
            res = res + jnp.where((si == 2 + c) & (li == k), centers[k][c], 0.0)
    return res


def _pushpull_multi_kernel(*args, n_items, n_chs):
    in_refs = args[:2 * n_items]
    out_refs = args[2 * n_items:]
    for it in range(n_items):
        emb = in_refs[2 * it][0]          # (C, R, 128)
        key = in_refs[2 * it + 1][0, 0]   # (R, 128) int32
        out_refs[it][0] = _pushpull_packed(emb, key, n_chs[it])


# ---------------------------------------------------------------------------
# Kernel 4: fused 1x1 conv heads, NCHW kept as (B, Cin, H*W) (no transpose)
# ---------------------------------------------------------------------------
def _conv1x1_kernel(w_ref, b_ref, x_ref, y_ref):
    x = x_ref[0]                                                # (Cin, tile)
    w = w_ref[...]                                              # (Cout, Cin)
    cin = w.shape[1]
    tile = x.shape[1]
    if cin <= 8:
        # tiny channel count: unrolled VPU FMAs instead of a <1%-utilized MXU matmul
        out = b_ref[...] + jnp.zeros((1, tile), jnp.float32)
        for ci in range(cin):
            out = out + w[:, ci:ci + 1] * x[ci:ci + 1, :]
    else:
        out = jnp.dot(w, x, preferred_element_type=jnp.float32) + b_ref[...]
    y_ref[0] = out


# ---------------------------------------------------------------------------
# Wrappers
# ---------------------------------------------------------------------------
def _seg_from_sums(bce_sum, inter, total, n):
    bce = bce_sum / n
    union = total - inter
    iou = (inter + IOU_SMOOTH) / (union + IOU_SMOOTH)
    return bce + (1.0 - iou)


def bev_losses(heads4, gt_seg_r, gt_off_r, gt_z_r, hw, hwp):
    """Fused: seg (BCE+IoU), BCELoss(gt_seg*sigmoid(offset_y), gt_offset_y),
    MSELoss(gt_seg*z, gt_z) — one streaming pass, channels read straight from heads4."""
    b = heads4.shape[0]
    r = heads4.shape[2]
    rt, n_chunks = _row_tiling(r)

    def spec(ch):
        return pl.BlockSpec((1, 1, rt, LANES), functools.partial(_ch_map, ch=ch))

    out = pl.pallas_call(
        functools.partial(_bev_loss_kernel, n_valid=hw, padded=(hwp != hw), row_tile=rt),
        out_shape=jax.ShapeDtypeStruct((b, 8, LANES), jnp.float32),
        grid_spec=pltpu.PrefetchScalarGridSpec(
            num_scalar_prefetch=0, grid=(b, n_chunks),
            in_specs=[spec(CH_PRED), spec(CH_OFFSET), spec(CH_Z),
                      spec(0), spec(0), spec(0)],
            out_specs=pl.BlockSpec((1, 8, LANES), lambda bb, i: (bb, 0, 0)),
            scratch_shapes=[pltpu.VMEM((rt, LANES), jnp.float32)] * 5),
        compiler_params=_mosaic(("parallel", "arbitrary")),
    )(heads4, heads4, heads4, gt_seg_r, gt_off_r, gt_z_r)

    sums = jnp.sum(out[:, 0, :], axis=0)
    n = float(b * hw)
    loss_seg = _seg_from_sums(sums[0], sums[1], sums[2], n)
    return loss_seg, sums[3] / n, sums[4] / n


def seg_losses_multi(pairs, hw, hwp):
    """pairs: list of ((pred_array4d, pred_channel), (gt_array4d, gt_channel));
    all arrays share (B, R).  One launch computes BCE+IoU for every pair."""
    b = pairs[0][0][0].shape[0]
    r = pairs[0][0][0].shape[2]
    rt, n_chunks = _row_tiling(r)
    n_pairs = len(pairs)

    arrays, specs = [], []
    for (pa, ca), (ga, cg) in pairs:
        arrays += [pa, ga]
        specs += [pl.BlockSpec((1, 1, rt, LANES), functools.partial(_ch_map, ch=ca)),
                  pl.BlockSpec((1, 1, rt, LANES), functools.partial(_ch_map, ch=cg))]

    out = pl.pallas_call(
        functools.partial(_seg_multi_kernel, n_pairs=n_pairs, n_valid=hw,
                          padded=(hwp != hw), row_tile=rt),
        out_shape=jax.ShapeDtypeStruct((b, 8, LANES), jnp.float32),
        grid_spec=pltpu.PrefetchScalarGridSpec(
            num_scalar_prefetch=0, grid=(b, n_chunks),
            in_specs=specs,
            out_specs=pl.BlockSpec((1, 8, LANES), lambda bb, i: (bb, 0, 0)),
            scratch_shapes=[pltpu.VMEM((rt, LANES), jnp.float32)] * (3 * n_pairs)),
        compiler_params=_mosaic(("parallel", "arbitrary")),
    )(*arrays)

    sums = jnp.sum(out[:, 0, :], axis=0)
    n = float(b * hw)
    return [_seg_from_sums(sums[3 * p], sums[3 * p + 1], sums[3 * p + 2], n)
            for p in range(n_pairs)]


def _pushpull_from_packed(packed, n_ch):
    """Combine the per-batch packed (B, 8, 128) kernel summaries into the scalar loss."""
    counts = packed[:, 0, :K_MAX]                              # (B, K)
    pulls = packed[:, 1, :K_MAX]                               # (B, K)
    centers = jnp.transpose(packed[:, 2:2 + n_ch, :K_MAX], (0, 2, 1))   # (B, K, C)

    valid_k = (counts > 0).astype(jnp.float32)
    pull_means = pulls / jnp.maximum(counts, 1.0)
    n_valid = jnp.sum(valid_k)
    pull = jnp.where(n_valid > 0,
                     jnp.sum(pull_means * valid_k) / jnp.maximum(n_valid, 1.0), 0.0)

    d = centers[:, :, None, :] - centers[:, None, :, :]
    dist = jnp.sqrt(jnp.sum(d * d, axis=-1) + 1e-12)
    pair = (valid_k[:, :, None] * valid_k[:, None, :]
            * (1.0 - jnp.eye(K_MAX, dtype=jnp.float32)[None]))
    hinge = jnp.maximum(MARGIN_DIST - dist, 0.0)
    n_pairs = jnp.sum(pair)
    push = jnp.where(n_pairs > 0,
                     jnp.sum(hinge * hinge * pair) / jnp.maximum(n_pairs, 1.0), 0.0)
    return VAR_WEIGHT * pull + DIST_WEIGHT * push


def pushpull_multi(items):
    """NDPushPullLoss(1.0, 1.0, 1.0, 5.0, 200) for one or more (emb, ids) pairs in
    a single launch.  items: list of ((emb_array4d, channel_block_index, n_ch), ids4d).
    torch.unique over instance ids (data dependent) is replaced by a fixed id
    range 1..K_MAX expressed as one-hot masks inside the kernel."""
    # TODO(synk): instance ids > K_MAX are dropped (torch.unique has no static Pallas equivalent).
    b = items[0][1].shape[0]
    r = items[0][1].shape[2]
    n_items = len(items)
    n_chs = tuple(it[0][2] for it in items)

    arrays, specs = [], []
    for (earr, chb, nc), ids in items:
        arrays += [earr, ids]
        specs += [pl.BlockSpec((1, nc, r, LANES), functools.partial(_chblk_map, ch=chb)),
                  pl.BlockSpec((1, 1, r, LANES), functools.partial(_chblk_map, ch=0))]

    out_shape = tuple(jax.ShapeDtypeStruct((b, 8, LANES), jnp.float32)
                      for _ in range(n_items))
    out_specs = tuple(pl.BlockSpec((1, 8, LANES), lambda bb: (bb, 0, 0))
                      for _ in range(n_items))

    outs = pl.pallas_call(
        functools.partial(_pushpull_multi_kernel, n_items=n_items, n_chs=n_chs),
        out_shape=out_shape,
        grid_spec=pltpu.PrefetchScalarGridSpec(
            num_scalar_prefetch=0, grid=(b,),
            in_specs=specs, out_specs=out_specs),
        compiler_params=_mosaic(("parallel",)),
    )(*arrays)
    if not isinstance(outs, (tuple, list)):
        outs = (outs,)
    return [_pushpull_from_packed(outs[i], n_chs[i]) for i in range(n_items)]


def conv1x1(w, b, x_nchw):
    """Fused 1x1 conv heads: x kept as (B, Cin, H*W) (no transpose), pixels on lanes.
    Returns the un-sliced (B, Cout, HWp) head tensor (loss kernels index it directly)."""
    bsz, cin, h, w_ = x_nchw.shape
    cout = w.shape[0]
    hw = h * w_
    hwp = _round_up(hw, LANES)
    tile = _pick_conv_tile(hwp)
    x3 = x_nchw.reshape(bsz, cin, hw).astype(jnp.float32)
    if hwp != hw:
        x3 = jnp.pad(x3, ((0, 0), (0, 0), (0, hwp - hw)))
    return pl.pallas_call(
        _conv1x1_kernel,
        out_shape=jax.ShapeDtypeStruct((bsz, cout, hwp), jnp.float32),
        grid_spec=pltpu.PrefetchScalarGridSpec(
            num_scalar_prefetch=0,
            grid=(bsz, hwp // tile),
            in_specs=[pl.BlockSpec((cout, cin), lambda bb, j: (0, 0)),
                      pl.BlockSpec((cout, 1), lambda bb, j: (0, 0)),
                      pl.BlockSpec((1, cin, tile), lambda bb, j: (bb, 0, j))],
            out_specs=pl.BlockSpec((1, cout, tile), lambda bb, j: (bb, 0, j))),
        compiler_params=_mosaic(("parallel", "parallel")),
    )(w.astype(jnp.float32), b.astype(jnp.float32), x3)


# ---------------------------------------------------------------------------
# Homography glue (torch.inverse / F.normalize / kornia denormalize + warp)
# ---------------------------------------------------------------------------
def _normal_transform_pixel(h, w):
    return jnp.array([[2.0 / (w - 1), 0.0, -1.0],
                      [0.0, 2.0 / (h - 1), -1.0],
                      [0.0, 0.0, 1.0]], jnp.float32)


def denormalize_homography(h_norm, src_hw, dst_hw):
    src_n = _normal_transform_pixel(*src_hw)
    dst_n_inv = jnp.linalg.inv(_normal_transform_pixel(*dst_hw))
    return dst_n_inv[None] @ h_norm @ src_n[None]


def warp_perspective(src, m, dsize):
    # kornia semantics: M maps src->dst pixel coords; dst pixel samples src at M^{-1}[x,y,1].
    # TODO(synk): the bilinear gather has no clean Pallas/TPU equivalent; kept as JAX glue.
    b, c, h, w = src.shape
    hd, wd = dsize
    minv = jnp.linalg.inv(m)
    ys, xs = jnp.meshgrid(jnp.arange(hd, dtype=jnp.float32),
                          jnp.arange(wd, dtype=jnp.float32), indexing="ij")
    pts = jnp.stack([xs.ravel(), ys.ravel(), jnp.ones(hd * wd, jnp.float32)], axis=0)
    sp = jnp.einsum("bij,jn->bin", minv, pts)
    sx = sp[:, 0, :] / (sp[:, 2, :] + 1e-8)
    sy = sp[:, 1, :] / (sp[:, 2, :] + 1e-8)
    x0 = jnp.floor(sx)
    y0 = jnp.floor(sy)
    x1 = x0 + 1.0
    y1 = y0 + 1.0
    wx = sx - x0
    wy = sy - y0
    flat = src.reshape(b, c, h * w)

    def gather(yc, xc):
        valid = ((xc >= 0) & (xc <= w - 1) & (yc >= 0) & (yc <= h - 1)).astype(src.dtype)
        xi = jnp.clip(xc, 0, w - 1).astype(jnp.int32)
        yi = jnp.clip(yc, 0, h - 1).astype(jnp.int32)
        idx = jnp.broadcast_to((yi * w + xi)[:, None, :], (b, c, hd * wd))
        return jnp.take_along_axis(flat, idx, axis=2) * valid[:, None, :]

    v00 = gather(y0, x0)
    v01 = gather(y0, x1)
    v10 = gather(y1, x0)
    v11 = gather(y1, x1)
    wx = wx[:, None, :]
    wy = wy[:, None, :]
    out = (v00 * (1 - wx) * (1 - wy) + v01 * wx * (1 - wy)
           + v10 * (1 - wx) * wy + v11 * wx * wy)
    return out.reshape(b, c, hd, wd)


# ---------------------------------------------------------------------------
# Combine_Model_and_Loss.forward (train=True path).  The external backbone is a
# stand-in: fused Pallas 1x1-conv heads + a fixed per-batch homography produce
# the output structure the wrapper expects.
# ---------------------------------------------------------------------------
def combine_model_and_loss_forward(params, inputs, images_gt, configs,
                                   gt_seg=None, gt_instance=None, gt_offset_y=None,
                                   gt_z=None, image_gt_segment=None,
                                   image_gt_instance=None, train=True):
    b, _, h, w = inputs.shape
    hw = h * w

    # synthetic model: one fused head tensor (12 channels), read once per loss kernel
    heads3 = conv1x1(params["w_heads"], params["b_heads"], inputs)     # (B, 12, HWp)
    hwp = heads3.shape[-1]
    r = hwp // LANES
    heads4 = heads3.reshape(b, N_HEADS, r, LANES)                      # free view

    pred = heads3[:, CH_PRED:CH_PRED + 1, :hw].reshape(b, 1, h, w)
    homography = params["homography"]
    # TODO(synk): the real model warps the image GT into its learned-homography frame;
    # here the GT carried in `images_gt` is passed through unchanged.
    image_gt_segment_h = images_gt[:, 0:1]
    image_gt_instance_h = images_gt[:, 1:2].astype(jnp.int32)

    if not train:
        return pred

    # ---- BEV losses: one fused streaming pass over pred/offset/z + 3 GT maps
    gt_seg_r, _, _ = _as_rows(gt_seg)
    gt_off_r, _, _ = _as_rows(gt_offset_y)
    gt_z_r, _, _ = _as_rows(gt_z)
    loss_seg, loss_offset, loss_z = bev_losses(heads4, gt_seg_r, gt_off_r, gt_z_r, hw, hwp)

    gt_inst_r, _, _ = _as_rows(gt_instance, dtype=jnp.int32)
    (loss_emb,) = pushpull_multi([((heads4, CHB_EMB_BEV, EMB_CH), gt_inst_r)])

    loss_total = (3.0 * loss_seg + 0.5 * loss_emb)[None]
    loss_offset = (60.0 * loss_offset)[None]
    loss_z = (30.0 * loss_z)[None]

    # ---- homography inverse + warps (JAX glue)
    pred_2d = heads3[:, CH_PRED2D:CH_PRED2D + 1, :hw].reshape(b, 1, h, w)
    emb_2d = heads3[:, CH_EMB_2D:CH_EMB_2D + EMB_CH, :hw].reshape(b, EMB_CH, h, w)
    h_inv = jnp.linalg.inv(homography)
    norm = jnp.sqrt(jnp.sum(h_inv * h_inv, axis=(1, 2), keepdims=True))
    h_inv = h_inv / jnp.maximum(norm, 1e-6)                 # F.normalize(dim=(1,2), p=2)
    hw2 = (pred_2d.shape[2], pred_2d.shape[3])
    h_inv = denormalize_homography(h_inv, hw2, hw2)
    pred_2d_h_invs = warp_perspective(pred_2d, h_inv, configs["output_2d_shape"])
    emb_2d_h_invs = warp_perspective(emb_2d, h_inv, configs["output_2d_shape"])

    # ---- 2D losses: fuse the (pred_2d, gt_h) and (warped pred_2d, gt) pairs
    gt2d_h_r, _, _ = _as_rows(image_gt_segment_h)
    gt2d_r, _, _ = _as_rows(image_gt_segment)
    pred_hg_r, hw_w, hwp_w = _as_rows(pred_2d_h_invs)
    emb_hg_r, _, _ = _as_rows(emb_2d_h_invs)
    inst_h_r, _, _ = _as_rows(image_gt_instance_h, dtype=jnp.int32)
    inst_r, _, _ = _as_rows(image_gt_instance, dtype=jnp.int32)

    fuse_2d = (hw_w == hw and hwp_w == hwp)
    if fuse_2d:
        loss_seg_2d, loss_seg_hg = seg_losses_multi(
            [((heads4, CH_PRED2D), (gt2d_h_r, 0)),
             ((pred_hg_r, 0), (gt2d_r, 0))], hw, hwp)
        loss_emb_2d, loss_emb_hg = pushpull_multi(
            [((heads4, CHB_EMB_2D, EMB_CH), inst_h_r),
             ((emb_hg_r, 0, EMB_CH), inst_r)])
    else:
        (loss_seg_2d,) = seg_losses_multi([((heads4, CH_PRED2D), (gt2d_h_r, 0))], hw, hwp)
        (loss_seg_hg,) = seg_losses_multi([((pred_hg_r, 0), (gt2d_r, 0))], hw_w, hwp_w)
        (loss_emb_2d,) = pushpull_multi([((heads4, CHB_EMB_2D, EMB_CH), inst_h_r)])
        (loss_emb_hg,) = pushpull_multi([((emb_hg_r, 0, EMB_CH), inst_r)])

    loss_total_2d = (3.0 * loss_seg_2d + 0.5 * loss_emb_2d)[None]
    loss_total_hg = 3.0 * loss_seg_hg + 0.5 * loss_emb_hg

    return (pred, loss_total, loss_total_2d, loss_offset, loss_z,
            homography, h_inv, loss_total_hg, loss_seg_hg, loss_emb_hg)


# ---------------------------------------------------------------------------
if __name__ == "__main__":
    key = jax.random.PRNGKey(0)
    B, CIN, H, W = 2, 3, 16, 16
    ks = jax.random.split(key, 12)

    params = {
        # fused head weights: channels [emb_bev(4), emb_2d(4), pred, offset, z, pred_2d]
        "w_heads": 0.5 * jax.random.normal(ks[0], (N_HEADS, CIN), jnp.float32),
        "b_heads": 0.1 * jax.random.normal(ks[1], (N_HEADS, 1), jnp.float32),
        "homography": jnp.eye(3, dtype=jnp.float32)[None]
                      + 0.02 * jax.random.normal(ks[4], (B, 3, 3), jnp.float32),
    }

    inputs = jax.random.normal(ks[5], (B, CIN, H, W), jnp.float32)
    gt_seg = (jax.random.uniform(ks[6], (B, 1, H, W)) < 0.3).astype(jnp.float32)
    gt_instance = jax.random.randint(ks[7], (B, 1, H, W), 0, K_MAX + 1).astype(jnp.int32)
    gt_offset_y = jax.random.uniform(ks[8], (B, 1, H, W)) * gt_seg
    gt_z = jax.random.normal(ks[9], (B, 1, H, W)) * gt_seg
    image_gt_segment = (jax.random.uniform(ks[10], (B, 1, H, W)) < 0.3).astype(jnp.float32)
    image_gt_instance = jax.random.randint(ks[11], (B, 1, H, W), 0, K_MAX + 1).astype(jnp.int32)
    images_gt = jnp.concatenate(
        [image_gt_segment, image_gt_instance.astype(jnp.float32)], axis=1)

    configs = {"output_2d_shape": (H, W)}

    outs = combine_model_and_loss_forward(
        params, inputs, images_gt, configs,
        gt_seg=gt_seg, gt_instance=gt_instance,
        gt_offset_y=gt_offset_y, gt_z=gt_z,
        image_gt_segment=image_gt_segment, image_gt_instance=image_gt_instance,
        train=True)
    jax.block_until_ready(outs)
    print("KERNEL_OK")
</pallas_src>

<mosaic_0001>
module attributes {stable_mosaic.version = 11 : i64} {
  func.func @_conv1x1_kernel(%arg0: i32, %arg1: i32, %arg2: memref<12x3xf32, #tpu.memory_space<vmem>>, %arg3: memref<12x1xf32, #tpu.memory_space<vmem>>, %arg4: memref<1x3x256xf32, #tpu.memory_space<vmem>>, %arg5: memref<1x12x256xf32, #tpu.memory_space<vmem>>) attributes {dimension_semantics = [#tpu.dimension_semantics<parallel>, #tpu.dimension_semantics<parallel>], iteration_bounds = array<i64: 2, 1>, scalar_prefetch = 0 : i64, scratch_operands = 0 : i64, tpu.core_type = #tpu.core_type<tc>, window_params = [{pipeline_mode = #tpu.pipeline_mode<synchronous>, transform_indices = @transform_0, window_bounds = array<i64: 12, 3>}, {pipeline_mode = #tpu.pipeline_mode<synchronous>, transform_indices = @transform_1, window_bounds = array<i64: 12, 1>}, {transform_indices = @transform_2, window_bounds = array<i64: 1, 3, 256>}, {transform_indices = @transform_3, window_bounds = array<i64: 1, 12, 256>}]} {
    %c0 = arith.constant 0 : index
    %c0_0 = arith.constant 0 : index
    %c0_1 = arith.constant 0 : index
    %0 = vector.load %arg4[%c0, %c0_0, %c0_1] : memref<1x3x256xf32, #tpu.memory_space<vmem>>, vector<1x3x256xf32>
    %1 = vector.shape_cast %0 : vector<1x3x256xf32> to vector<3x256xf32>
    %c0_2 = arith.constant 0 : index
    %c0_3 = arith.constant 0 : index
    %2 = vector.load %arg2[%c0_2, %c0_3] : memref<12x3xf32, #tpu.memory_space<vmem>>, vector<12x3xf32>
    %c0_4 = arith.constant 0 : index
    %c0_5 = arith.constant 0 : index
    %3 = vector.load %arg3[%c0_4, %c0_5] : memref<12x1xf32, #tpu.memory_space<vmem>>, vector<12x1xf32>
    %cst = arith.constant 0.000000e+00 : f32
    %4 = vector.broadcast %cst : f32 to vector<1x256xf32>
    %5 = vector.broadcast %3 : vector<12x1xf32> to vector<12x256xf32>
    %6 = vector.broadcast %4 : vector<1x256xf32> to vector<12x256xf32>
    %7 = arith.addf %5, %6 : vector<12x256xf32>
    %8 = vector.extract_strided_slice %2 {offsets = [0, 0], sizes = [12, 1], strides = [1, 1]} : vector<12x3xf32> to vector<12x1xf32>
    %9 = vector.extract_strided_slice %1 {offsets = [0, 0], sizes = [1, 256], strides = [1, 1]} : vector<3x256xf32> to vector<1x256xf32>
    %10 = vector.broadcast %8 : vector<12x1xf32> to vector<12x256xf32>
    %11 = vector.broadcast %9 : vector<1x256xf32> to vector<12x256xf32>
    %12 = arith.mulf %10, %11 : vector<12x256xf32>
    %13 = arith.addf %7, %12 : vector<12x256xf32>
    %14 = vector.extract_strided_slice %2 {offsets = [0, 1], sizes = [12, 1], strides = [1, 1]} : vector<12x3xf32> to vector<12x1xf32>
    %15 = vector.extract_strided_slice %1 {offsets = [1, 0], sizes = [1, 256], strides = [1, 1]} : vector<3x256xf32> to vector<1x256xf32>
    %16 = vector.broadcast %14 : vector<12x1xf32> to vector<12x256xf32>
    %17 = vector.broadcast %15 : vector<1x256xf32> to vector<12x256xf32>
    %18 = arith.mulf %16, %17 : vector<12x256xf32>
    %19 = arith.addf %13, %18 : vector<12x256xf32>
    %20 = vector.extract_strided_slice %2 {offsets = [0, 2], sizes = [12, 1], strides = [1, 1]} : vector<12x3xf32> to vector<12x1xf32>
    %21 = vector.extract_strided_slice %1 {offsets = [2, 0], sizes = [1, 256], strides = [1, 1]} : vector<3x256xf32> to vector<1x256xf32>
    %22 = vector.broadcast %20 : vector<12x1xf32> to vector<12x256xf32>
    %23 = vector.broadcast %21 : vector<1x256xf32> to vector<12x256xf32>
    %24 = arith.mulf %22, %23 : vector<12x256xf32>
    %25 = arith.addf %19, %24 : vector<12x256xf32>
    %c0_6 = arith.constant 0 : index
    %c0_7 = arith.constant 0 : index
    %c0_8 = arith.constant 0 : index
    %26 = vector.load %arg5[%c0_6, %c0_7, %c0_8] : memref<1x12x256xf32, #tpu.memory_space<vmem>>, vector<1x12x256xf32>
    %27 = vector.shape_cast %26 : vector<1x12x256xf32> to vector<12x256xf32>
    %28 = vector.shape_cast %25 : vector<12x256xf32> to vector<1x12x256xf32>
    tpu.vector_store %arg5[%c0_6, %c0_7, %c0_8], %28 {strides = array<i32>} : memref<1x12x256xf32, #tpu.memory_space<vmem>>, vector<1x12x256xf32>,
    return
  }
  func.func @transform_0(%arg0: i32, %arg1: i32) -> (i32, i32) {
    %c0_i32 = arith.constant 0 : i32
    %c0_i32_0 = arith.constant 0 : i32
    %c0_i32_1 = arith.constant 0 : i32
    return %c0_i32, %c0_i32_0 : i32, i32
  }
  func.func @transform_1(%arg0: i32, %arg1: i32) -> (i32, i32) {
    %c0_i32 = arith.constant 0 : i32
    %c0_i32_0 = arith.constant 0 : i32
    %c0_i32_1 = arith.constant 0 : i32
    return %c0_i32, %c0_i32_0 : i32, i32
  }
  func.func @transform_2(%arg0: i32, %arg1: i32) -> (i32, i32, i32) {
    %c0_i32 = arith.constant 0 : i32
    %c0_i32_0 = arith.constant 0 : i32
    return %arg0, %c0_i32, %arg1 : i32, i32, i32
  }
  func.func @transform_3(%arg0: i32, %arg1: i32) -> (i32, i32, i32) {
    %c0_i32 = arith.constant 0 : i32
    %c0_i32_0 = arith.constant 0 : i32
    return %arg0, %c0_i32, %arg1 : i32, i32, i32
  }
}

</mosaic_0001>

<bundles_post_ra>
// kernel: tpu_custom_call.1
= control target key start
LH: loop header
LB: loop body
LE: loop exit
PB: predicated region body
PF: predicated region fallthrough
CT: control target
= control target key end

     0   :  { %s516_s12 = smov 0   ;;  %s518_s13 = smov 0   ;;  %s569_s0 = inlined_call_operand.vmem [shape: f32[12,3], index: 0, kind: input, shape index: {}]   ;;  %s570_s1 = inlined_call_operand.vmem [shape: f32[12,1], index: 1, kind: input, shape index: {}]   ;;  %s571_s2 = inlined_call_operand.vmem [shape: f32[2,3,256], index: 2, kind: input, shape index: {}]   ;;  %s572_s3 = inlined_call_operand.vmem [shape: f32[2,12,256], index: 3, kind: output, shape index: {}]  }
   0x1   :  { %s520_s14 = smov 0  }
   0x2 LB: > { %s25_s15 = sadd.s32 1, %s487_s13  ;;  %p427_p0 = scmp.ge.s32.totalorder %s491_s14, 1  ;;  %s491_s14 = sphi %s520_s14, %s13_s14   ;;  %s487_s13 = sphi %s518_s13, %s574_s13   ;;  %s483_s12 = sphi %s516_s12, %s573_s12  }
   0x3   : > { %p27_p1 = scmp.ge.s32.totalorder %s25_s15, 2  ;;  %p158_p2 = scmp.lt.s32.totalorder %s491_s14, 3 }
   0x5   : > { %s576_s15 = smov (%p27_p1, %s25_s15), 0  ;;  %p159_p3 = pnand %p427_p0, %p158_p2 }
   0x6   : > { %v213_v0 = vld [vmem:[%s570_s1] sm:$0xff] (!%p159_p3)  ;;  %v493_v2 = vmov (!%p159_p3), 0   ;;  %v214_v3 = vld [vmem:[%s570_s1 + $0x8] sm:$0xf] (!%p159_p3)  ;;  %v494_v5 = vmov (!%p159_p3), 1   ;;  %v495_v6 = vmov (!%p159_p3), 2   ;;  %v238_v7 = vlaneseq (!%p159_p3) }
   0x7   : > { %162 = sbr.rel (%p159_p3) target bundleno = 156 (0x9c), region = 32  ;;  %v211_v1 = vld [vmem:[%s569_s0] sm:$0xff] (!%p159_p3)  ;;  %464 = vset.pattern.permute.xlu1 (!%p159_p3), %v493_v2  ;;  %463 = vset.pattern.permute.xlu0 (!%p159_p3), %v493_v2  ;;  %v212_v4 = vld [vmem:[%s569_s0 + $0x8] sm:$0xf] (!%p159_p3)  ;;  %p191_p4 = scmp.lt.s32.totalorder (!%p159_p3), %s483_s12, 1 }
   0x8   : > { %217 = vperm.xlu1 (!%p159_p3), %464, %v213_v0   ;;  %229 = vperm.xlu0 (!%p159_p3), %463, %v211_v1   ;;  %v239_v8 = vshrl.u32 (!%p159_p3), %v238_v7, 7 }
   0xa   : > { %v240_v9 = vsub.s32 (!%p159_p3), 0, %v239_v8  ;;  %v244_v10 = vsub.s32 (!%p159_p3), 4, %v239_v8  ;;  %v274_v12 = vsub.s32 (!%p159_p3), 1, %v239_v8  ;;  %v278_v13 = vsub.s32 (!%p159_p3), 5, %v239_v8 }
   0xb   : > { %v308_v20 = vsub.s32 (!%p159_p3), 2, %v239_v8  ;;  %v312_v21 = vsub.s32 (!%p159_p3), 6, %v239_v8 }
   0xc   : > { %222 = vperm.xlu1 (!%p159_p3), %464, %v214_v3   ;;  %234 = vperm.xlu0 (!%p159_p3), %463, %v212_v4  }
   0xe   : > { %s578_s12 = smov (!%p191_p4, %s483_s12), 1 }
   0xf   : > { %s434_s24 = sshll.u32 %s578_s12, 3  ;;  %s435_s28 = sshll.u32 %s578_s12, 5 }
  0x10   : > { %466 = vset.pattern.permute.xlu1 %v494_v5  ;;  %465 = vset.pattern.permute.xlu0 %v494_v5  ;;  %s198_s27 = scalar_lea.vmem %s571_s2, %s434_s24  ;;  %s208_s4 = scalar_lea.vmem %s572_s3, %s435_s28 }
  0x11   : > { %269 = vperm.xlu1 %466, %v212_v4   ;;  %265 = vperm.xlu0 %465, %v211_v1   ;;  %v210_v11 = vld [vmem:[%s198_s27] sm:$0x77] }
  0x12   : > { %v241_v16 = vrot.slane %v210_v11, %v240_v9  ;;  %v245_v17 = vrot.slane %v210_v11, %v244_v10  ;;  %v275_v18 = vrot.slane %v210_v11, %v274_v12  ;;  %v279_v19 = vrot.slane %v210_v11, %v278_v13 }
  0x13   : > { %v309_v28 = vrot.slane %v210_v11, %v308_v20  ;;  %v313_v29 = vrot.slane %v210_v11, %v312_v21 }
  0x14   : > { %v251_v22 = vrot.slane %v241_v16, %v240_v9  ;;  %v255_v23 = vrot.slane %v245_v17, %v240_v9  ;;  %v285_v26 = vrot.slane %v275_v18, %v274_v12  ;;  %v289_v27 = vrot.slane %v279_v19, %v274_v12 }
  0x15   : > { %467 = vset.pattern.permute.xlu1 %v495_v6  ;;  %468 = vset.pattern.permute.xlu0 %v495_v6  ;;  %v319_v40 = vrot.slane %v309_v28, %v308_v20  ;;  %v323_v41 = vrot.slane %v313_v29, %v308_v20 }
  0x16   : > { %299 = vperm.xlu1 %467, %v211_v1   ;;  %303 = vperm.xlu0 %468, %v212_v4  }
  0x87   : > { %v218_v14 = vpop.permute.xlu1 %217  ;;  %v230_v15 = vpop.permute.xlu0 %229 }
  0x88   : > { %v256_v30 = vmul.f32 %v251_v22, %v230_v15  ;;  %v257_v31 = vmul.f32 %v255_v23, %v230_v15 }
  0x8a   : > { %v260_v42 = vadd.f32 %v256_v30, %v218_v14  ;;  %v261_v43 = vadd.f32 %v257_v31, %v218_v14 }
  0x8b   : > { %v223_v24 = vpop.permute.xlu1 %222  ;;  %v235_v25 = vpop.permute.xlu0 %234 }
  0x8c   : > { %v258_v32 = vmul.f32 %v251_v22, %v235_v25  ;;  %v259_v33 = vmul.f32 %v255_v23, %v235_v25 }
  0x8e   : > { %v262_v44 = vadd.f32 %v258_v32, %v223_v24  ;;  %v263_v45 = vadd.f32 %v259_v33, %v223_v24 }
  0x90   : > { %v270_v34 = vpop.permute.xlu1 %269  ;;  %v266_v35 = vpop.permute.xlu0 %265 }
  0x91   : > { %v292_v36 = vmul.f32 %v285_v26, %v270_v34  ;;  %v293_v37 = vmul.f32 %v289_v27, %v270_v34  ;;  %v290_v38 = vmul.f32 %v285_v26, %v266_v35  ;;  %v291_v39 = vmul.f32 %v289_v27, %v266_v35 }
  0x93   : > { %v296_v46 = vadd.f32 %v292_v36, %v262_v44  ;;  %v297_v47 = vadd.f32 %v293_v37, %v263_v45  ;;  %v294_v48 = vadd.f32 %v290_v38, %v260_v42  ;;  %v295_v49 = vadd.f32 %v291_v39, %v261_v43 }
  0x95   : > { %v300_v50 = vpop.permute.xlu1 %299  ;;  %v304_v51 = vpop.permute.xlu0 %303 }
  0x96   : > { %v324_v52 = vmul.f32 %v319_v40, %v300_v50  ;;  %v325_v53 = vmul.f32 %v323_v41, %v300_v50  ;;  %v326_v54 = vmul.f32 %v319_v40, %v304_v51  ;;  %v327_v55 = vmul.f32 %v323_v41, %v304_v51 }
  0x98   : > { %v328_v56 = vadd.f32 %v324_v52, %v294_v48  ;;  %v329_v57 = vadd.f32 %v325_v53, %v295_v49  ;;  %v330_v58 = vadd.f32 %v326_v54, %v296_v46  ;;  %v331_v59 = vadd.f32 %v327_v55, %v297_v47 }
  0x9a   : > { %332 = vst [vmem:[%s208_s4] sm:$0xff] %v328_v56  ;;  %333 = vst [vmem:[%s208_s4 + $0x8] sm:$0xff] %v329_v57 }
  0x9b   : > { %334 = vst [vmem:[%s208_s4 + $0x10] sm:$0xf] %v330_v58  ;;  %335 = vst [vmem:[%s208_s4 + $0x18] sm:$0xf] %v331_v59 }
  0x9c PF: > { %s13_s14 = sadd.s32 1, %s491_s14   ;;  %s573_s12 = smov %s487_s13 }
  0x9d   : > { %p10_p5 = scmp.ge.s32.totalorder %s13_s14, 4   ;;  %s574_s13 = smov %s576_s15 }
  0x9f   :  { %12 = sbr.rel (!%p10_p5) target bundleno = 2 (0x2), region = 62 }

</bundles_post_ra>
